<compile_context>
chip_gen: v5e
topology: v5e:2x2
jax: 0.10.0
libtpu: 0.0.40
codegen_flags: <defaults>
</compile_context>

<pallas_src>
import math

import jax
import jax.numpy as jnp
from jax.experimental import pallas as pl
from jax.experimental.pallas import tpu as pltpu

TEMPERATURE = 0.1
EPS = 1e-12                      # torch.nn.functional.normalize default eps
SQRT_INV_T = math.sqrt(1.0 / TEMPERATURE)


def _infonce_kernel(a_row_ref, p_ref, a_col_ref, loss_ref,
                    m_sc, l_sc, pos_sc, sim_sc):
    i = pl.program_id(0)          # row-tile index (parallel)
    j = pl.program_id(1)          # column-tile index (streaming LSE axis)
    f32 = jnp.float32
    sqrt_inv_t = f32(SQRT_INV_T)
    eps_sq = f32(EPS * EPS)

    # --- L2 normalize the anchor row block, folding sqrt(1/T) into the scale.
    # rsqrt(max(sum_sq, eps^2)) == 1 / max(||x||, eps)  (EUP slot, no div).
    a_row = a_row_ref[...].astype(f32)
    inv_na = jax.lax.rsqrt(
        jnp.maximum(jnp.sum(a_row * a_row, axis=1, keepdims=True), eps_sq))
    a_row_s = a_row * (inv_na * sqrt_inv_t)          # â_r * sqrt(1/T)

    # --- same for the anchor column block (the "keys" of the sim matrix).
    a_col = a_col_ref[...].astype(f32)
    inv_nc = jax.lax.rsqrt(
        jnp.maximum(jnp.sum(a_col * a_col, axis=1, keepdims=True), eps_sq))
    a_col_s = a_col * (inv_nc * sqrt_inv_t)          # â_c * sqrt(1/T)

    @pl.when(j == 0)
    def _():
        # init streaming-LSE state
        m_sc[...] = jnp.full(m_sc.shape, -jnp.inf, dtype=f32)
        l_sc[...] = jnp.zeros(l_sc.shape, dtype=f32)
        # positive similarity per row, already /T.  The normalized positive is
        # never materialized: 1/||p|| (and the remaining sqrt(1/T)) commute
        # through the row sum.
        p = p_ref[...].astype(f32)
        inv_np = jax.lax.rsqrt(
            jnp.maximum(jnp.sum(p * p, axis=1, keepdims=True), eps_sq))
        pos_sc[...] = (jnp.sum(a_row_s * p, axis=1, keepdims=True)
                       * (inv_np * sqrt_inv_t))

    # --- sim block on the MXU, contracting last dims (no transpose), already /T.
    # bf16 inputs keep bf16 MXU operands; accumulation stays f32.
    mxu_dtype = jnp.bfloat16 if a_row_ref.dtype == jnp.bfloat16 else jnp.float32
    sim_sc[...] = jax.lax.dot_general(
        a_row_s.astype(mxu_dtype), a_col_s.astype(mxu_dtype),
        dimension_numbers=(((1,), (1,)), ((), ())),
        preferred_element_type=jnp.float32)

    # --- diagonal replacement only on the i == j block (tiles are square, so
    # the global diagonal is exactly the local diagonal there).
    # masked_fill(diag, -inf) followed by diag assignment == diag = pos_sim.
    @pl.when(i == j)
    def _():
        tb = sim_sc.shape[0]
        row = jax.lax.broadcasted_iota(jnp.int32, (tb, tb), 0)
        col = jax.lax.broadcasted_iota(jnp.int32, (tb, tb), 1)
        sim_sc[...] = jnp.where(row == col, pos_sc[...], sim_sc[...])

    # --- streaming logsumexp update over column blocks.
    s = sim_sc[...]
    m_prev = m_sc[...]
    m_new = jnp.maximum(m_prev, jnp.max(s, axis=1, keepdims=True))
    l_sc[...] = (jnp.exp(m_prev - m_new) * l_sc[...]
                 + jnp.sum(jnp.exp(s - m_new), axis=1, keepdims=True))
    m_sc[...] = m_new

    @pl.when(j == pl.num_programs(1) - 1)
    def _():
        # loss_r = -log_softmax(sim)[r, r] = logsumexp(sim_r) - pos_sim_r
        loss_ref[...] = (m_sc[...] + jnp.log(l_sc[...])) - pos_sc[...]


def contrastive_loss(embeddings1, embeddings2, *, block_b=256):
    # TODO(synk): only the infonce / negatives=None path of ContrastiveLoss is
    # implemented (that is what forward(emb1, emb2) uses); the explicit-negatives
    # and triplet paths are not translated.
    B, D = embeddings1.shape
    if B % block_b != 0:
        block_b = B                       # small / non-divisible: single tile
    tb = block_b
    grid = (B // tb, B // tb)

    loss_rows = pl.pallas_call(
        _infonce_kernel,
        out_shape=jax.ShapeDtypeStruct((B, 1), jnp.float32),
        grid_spec=pltpu.PrefetchScalarGridSpec(
            num_scalar_prefetch=0,
            grid=grid,
            in_specs=[
                pl.BlockSpec((tb, D), lambda i, j: (i, 0)),   # anchor rows
                pl.BlockSpec((tb, D), lambda i, j: (i, 0)),   # positive rows
                pl.BlockSpec((tb, D), lambda i, j: (j, 0)),   # anchor cols
            ],
            out_specs=pl.BlockSpec((tb, 1), lambda i, j: (i, 0)),
            scratch_shapes=[
                pltpu.VMEM((tb, 1), jnp.float32),    # running max m
                pltpu.VMEM((tb, 1), jnp.float32),    # running sum l
                pltpu.VMEM((tb, 1), jnp.float32),    # pos_sim (already /T)
                pltpu.VMEM((tb, tb), jnp.float32),   # sim block
            ],
        ),
        compiler_params=pltpu.CompilerParams(
            dimension_semantics=("parallel", "arbitrary")),
    )(embeddings1, embeddings2, embeddings1)

    # reduction='mean' over per-sample losses (tiny (B,) reduce, fused by XLA)
    return jnp.mean(loss_rows)


def _reference(embeddings1, embeddings2):
    # pure-JAX reference matching the torch semantics, for validation
    a = embeddings1.astype(jnp.float32)
    p = embeddings2.astype(jnp.float32)
    a = a / jnp.maximum(jnp.linalg.norm(a, axis=1, keepdims=True), EPS)
    p = p / jnp.maximum(jnp.linalg.norm(p, axis=1, keepdims=True), EPS)
    pos = jnp.sum(a * p, axis=1) / TEMPERATURE
    sim = (a @ a.T) / TEMPERATURE
    B = a.shape[0]
    sim = sim.at[jnp.arange(B), jnp.arange(B)].set(pos)
    lse = jax.scipy.special.logsumexp(sim, axis=1)
    return jnp.mean(lse - pos)


if __name__ == "__main__":
    key = jax.random.PRNGKey(0)
    k1, k2 = jax.random.split(key)
    B, D = 8, 32
    emb1 = jax.random.normal(k1, (B, D), dtype=jnp.float32)
    emb2 = jax.random.normal(k2, (B, D), dtype=jnp.float32)

    loss = contrastive_loss(emb1, emb2)
    jax.block_until_ready(loss)

    ref = _reference(emb1, emb2)
    assert jnp.allclose(loss, ref, rtol=1e-4, atol=1e-4), (loss, ref)

    print("KERNEL_OK")
</pallas_src>

<mosaic_0001>
module attributes {stable_mosaic.version = 11 : i64} {
  func.func @_infonce_kernel(%arg0: i32, %arg1: i32, %arg2: memref<8x32xf32, #tpu.memory_space<vmem>>, %arg3: memref<8x32xf32, #tpu.memory_space<vmem>>, %arg4: memref<8x32xf32, #tpu.memory_space<vmem>>, %arg5: memref<8x1xf32, #tpu.memory_space<vmem>>, %arg6: memref<8x1xf32, #tpu.memory_space<vmem>>, %arg7: memref<8x1xf32, #tpu.memory_space<vmem>>, %arg8: memref<8x1xf32, #tpu.memory_space<vmem>>, %arg9: memref<8x8xf32, #tpu.memory_space<vmem>>) attributes {dimension_semantics = [#tpu.dimension_semantics<parallel>, #tpu.dimension_semantics<arbitrary>], iteration_bounds = array<i64: 1, 1>, scalar_prefetch = 0 : i64, scratch_operands = 4 : i64, tpu.core_type = #tpu.core_type<tc>, window_params = [{transform_indices = @transform_0, window_bounds = array<i64: 8, 32>}, {transform_indices = @transform_1, window_bounds = array<i64: 8, 32>}, {transform_indices = @transform_2, window_bounds = array<i64: 8, 32>}, {transform_indices = @transform_3, window_bounds = array<i64: 8, 1>}]} {
    %c0 = arith.constant 0 : index
    %c0_0 = arith.constant 0 : index
    %0 = vector.load %arg2[%c0, %c0_0] : memref<8x32xf32, #tpu.memory_space<vmem>>, vector<8x32xf32>
    %1 = arith.mulf %0, %0 : vector<8x32xf32>
    %cst = arith.constant dense<0.000000e+00> : vector<8xf32>
    %2 = vector.multi_reduction <add>, %1, %cst [1] : vector<8x32xf32> to vector<8xf32>
    %3 = vector.shape_cast %2 : vector<8xf32> to vector<8x1xf32>
    %cst_1 = arith.constant 1.000000e-24 : f32
    %4 = vector.broadcast %cst_1 : f32 to vector<8x1xf32>
    %5 = arith.maximumf %3, %4 : vector<8x1xf32>
    %6 = math.rsqrt %5 : vector<8x1xf32>
    %cst_2 = arith.constant 3.1622777 : f32
    %7 = vector.broadcast %cst_2 : f32 to vector<8x1xf32>
    %8 = arith.mulf %6, %7 : vector<8x1xf32>
    %9 = vector.broadcast %8 : vector<8x1xf32> to vector<8x32xf32>
    %10 = arith.mulf %0, %9 : vector<8x32xf32>
    %c0_3 = arith.constant 0 : index
    %c0_4 = arith.constant 0 : index
    %11 = vector.load %arg4[%c0_3, %c0_4] : memref<8x32xf32, #tpu.memory_space<vmem>>, vector<8x32xf32>
    %12 = arith.mulf %11, %11 : vector<8x32xf32>
    %cst_5 = arith.constant dense<0.000000e+00> : vector<8xf32>
    %13 = vector.multi_reduction <add>, %12, %cst_5 [1] : vector<8x32xf32> to vector<8xf32>
    %14 = vector.shape_cast %13 : vector<8xf32> to vector<8x1xf32>
    %cst_6 = arith.constant 1.000000e-24 : f32
    %15 = vector.broadcast %cst_6 : f32 to vector<8x1xf32>
    %16 = arith.maximumf %14, %15 : vector<8x1xf32>
    %17 = math.rsqrt %16 : vector<8x1xf32>
    %cst_7 = arith.constant 3.1622777 : f32
    %18 = vector.broadcast %cst_7 : f32 to vector<8x1xf32>
    %19 = arith.mulf %17, %18 : vector<8x1xf32>
    %20 = vector.broadcast %19 : vector<8x1xf32> to vector<8x32xf32>
    %21 = arith.mulf %11, %20 : vector<8x32xf32>
    %c0_i32 = arith.constant 0 : i32
    %22 = arith.cmpi eq, %arg1, %c0_i32 : i32
    %23 = arith.extui %22 : i1 to i32
    %cst_8 = arith.constant 1.000000e-24 : f32
    %cst_9 = arith.constant 3.1622777 : f32
    %c0_i32_10 = arith.constant 0 : i32
    %24 = arith.cmpi ne, %23, %c0_i32_10 : i32
    scf.if %24 {
      %cst_29 = arith.constant 0xFF800000 : f32
      %50 = vector.broadcast %cst_29 : f32 to vector<8x1xf32>
      %c0_30 = arith.constant 0 : index
      %c0_31 = arith.constant 0 : index
      %51 = vector.load %arg6[%c0_30, %c0_31] : memref<8x1xf32, #tpu.memory_space<vmem>>, vector<8x1xf32>
      tpu.vector_store %arg6[%c0_30, %c0_31], %50 {strides = array<i32>} : memref<8x1xf32, #tpu.memory_space<vmem>>, vector<8x1xf32>,
      %cst_32 = arith.constant 0.000000e+00 : f32
      %52 = vector.broadcast %cst_32 : f32 to vector<8x1xf32>
      %c0_33 = arith.constant 0 : index
      %c0_34 = arith.constant 0 : index
      %53 = vector.load %arg7[%c0_33, %c0_34] : memref<8x1xf32, #tpu.memory_space<vmem>>, vector<8x1xf32>
      tpu.vector_store %arg7[%c0_33, %c0_34], %52 {strides = array<i32>} : memref<8x1xf32, #tpu.memory_space<vmem>>, vector<8x1xf32>,
      %c0_35 = arith.constant 0 : index
      %c0_36 = arith.constant 0 : index
      %54 = vector.load %arg3[%c0_35, %c0_36] : memref<8x32xf32, #tpu.memory_space<vmem>>, vector<8x32xf32>
      %55 = arith.mulf %54, %54 : vector<8x32xf32>
      %cst_37 = arith.constant dense<0.000000e+00> : vector<8xf32>
      %56 = vector.multi_reduction <add>, %55, %cst_37 [1] : vector<8x32xf32> to vector<8xf32>
      %57 = vector.shape_cast %56 : vector<8xf32> to vector<8x1xf32>
      %58 = vector.broadcast %cst_8 : f32 to vector<8x1xf32>
      %59 = arith.maximumf %57, %58 : vector<8x1xf32>
      %60 = math.rsqrt %59 : vector<8x1xf32>
      %61 = arith.mulf %10, %54 : vector<8x32xf32>
      %cst_38 = arith.constant dense<0.000000e+00> : vector<8xf32>
      %62 = vector.multi_reduction <add>, %61, %cst_38 [1] : vector<8x32xf32> to vector<8xf32>
      %63 = vector.shape_cast %62 : vector<8xf32> to vector<8x1xf32>
      %64 = vector.broadcast %cst_9 : f32 to vector<8x1xf32>
      %65 = arith.mulf %60, %64 : vector<8x1xf32>
      %66 = arith.mulf %63, %65 : vector<8x1xf32>
      %c0_39 = arith.constant 0 : index
      %c0_40 = arith.constant 0 : index
      %67 = vector.load %arg8[%c0_39, %c0_40] : memref<8x1xf32, #tpu.memory_space<vmem>>, vector<8x1xf32>
      tpu.vector_store %arg8[%c0_39, %c0_40], %66 {strides = array<i32>} : memref<8x1xf32, #tpu.memory_space<vmem>>, vector<8x1xf32>,
    } else {
    }
    %cst_11 = arith.constant dense<0.000000e+00> : vector<8x8xf32>
    %25 = tpu.matmul %10, %21, %cst_11 {dimension_numbers = #tpu.dot_dimension_numbers<[1], [1], [0], [0], [0, 0, 1, 0], [], []>} : vector<8x32xf32>, vector<8x32xf32>, vector<8x8xf32> -> vector<8x8xf32>
    %c0_12 = arith.constant 0 : index
    %c0_13 = arith.constant 0 : index
    %26 = vector.load %arg9[%c0_12, %c0_13] : memref<8x8xf32, #tpu.memory_space<vmem>>, vector<8x8xf32>
    tpu.vector_store %arg9[%c0_12, %c0_13], %25 {strides = array<i32>} : memref<8x8xf32, #tpu.memory_space<vmem>>, vector<8x8xf32>,
    %27 = arith.cmpi eq, %arg0, %arg1 : i32
    %28 = arith.extui %27 : i1 to i32
    %c0_i32_14 = arith.constant 0 : i32
    %29 = arith.cmpi ne, %28, %c0_i32_14 : i32
    scf.if %29 {
      %50 = tpu.iota {dimensions = array<i32: 0>} : vector<8x8xi32>
      %51 = tpu.iota {dimensions = array<i32: 1>} : vector<8x8xi32>
      %52 = arith.cmpi eq, %50, %51 : vector<8x8xi32>
      %c0_29 = arith.constant 0 : index
      %c0_30 = arith.constant 0 : index
      %53 = vector.load %arg8[%c0_29, %c0_30] : memref<8x1xf32, #tpu.memory_space<vmem>>, vector<8x1xf32>
      %c0_31 = arith.constant 0 : index
      %c0_32 = arith.constant 0 : index
      %54 = vector.load %arg9[%c0_31, %c0_32] : memref<8x8xf32, #tpu.memory_space<vmem>>, vector<8x8xf32>
      %55 = vector.shape_cast %53 : vector<8x1xf32> to vector<8x1xf32>
      %56 = vector.broadcast %55 : vector<8x1xf32> to vector<8x8xf32>
      %57 = arith.select %52, %56, %54 : vector<8x8xi1>, vector<8x8xf32>
      %c0_33 = arith.constant 0 : index
      %c0_34 = arith.constant 0 : index
      %58 = vector.load %arg9[%c0_33, %c0_34] : memref<8x8xf32, #tpu.memory_space<vmem>>, vector<8x8xf32>
      tpu.vector_store %arg9[%c0_33, %c0_34], %57 {strides = array<i32>} : memref<8x8xf32, #tpu.memory_space<vmem>>, vector<8x8xf32>,
    } else {
    }
    %c0_15 = arith.constant 0 : index
    %c0_16 = arith.constant 0 : index
    %30 = vector.load %arg9[%c0_15, %c0_16] : memref<8x8xf32, #tpu.memory_space<vmem>>, vector<8x8xf32>
    %c0_17 = arith.constant 0 : index
    %c0_18 = arith.constant 0 : index
    %31 = vector.load %arg6[%c0_17, %c0_18] : memref<8x1xf32, #tpu.memory_space<vmem>>, vector<8x1xf32>
    %cst_19 = arith.constant dense<0xFF800000> : vector<8xf32>
    %32 = vector.multi_reduction <maximumf>, %30, %cst_19 [1] : vector<8x8xf32> to vector<8xf32>
    %33 = vector.shape_cast %32 : vector<8xf32> to vector<8x1xf32>
    %34 = arith.maximumf %31, %33 : vector<8x1xf32>
    %35 = arith.subf %31, %34 : vector<8x1xf32>
    %36 = math.exp %35 : vector<8x1xf32>
    %c0_20 = arith.constant 0 : index
    %c0_21 = arith.constant 0 : index
    %37 = vector.load %arg7[%c0_20, %c0_21] : memref<8x1xf32, #tpu.memory_space<vmem>>, vector<8x1xf32>
    %38 = arith.mulf %36, %37 : vector<8x1xf32>
    %39 = vector.broadcast %34 : vector<8x1xf32> to vector<8x8xf32>
    %40 = arith.subf %30, %39 : vector<8x8xf32>
    %41 = math.exp %40 : vector<8x8xf32>
    %cst_22 = arith.constant dense<0.000000e+00> : vector<8xf32>
    %42 = vector.multi_reduction <add>, %41, %cst_22 [1] : vector<8x8xf32> to vector<8xf32>
    %43 = vector.shape_cast %42 : vector<8xf32> to vector<8x1xf32>
    %44 = arith.addf %38, %43 : vector<8x1xf32>
    %c0_23 = arith.constant 0 : index
    %c0_24 = arith.constant 0 : index
    %45 = vector.load %arg7[%c0_23, %c0_24] : memref<8x1xf32, #tpu.memory_space<vmem>>, vector<8x1xf32>
    tpu.vector_store %arg7[%c0_23, %c0_24], %44 {strides = array<i32>} : memref<8x1xf32, #tpu.memory_space<vmem>>, vector<8x1xf32>,
    %c0_25 = arith.constant 0 : index
    %c0_26 = arith.constant 0 : index
    %46 = vector.load %arg6[%c0_25, %c0_26] : memref<8x1xf32, #tpu.memory_space<vmem>>, vector<8x1xf32>
    tpu.vector_store %arg6[%c0_25, %c0_26], %34 {strides = array<i32>} : memref<8x1xf32, #tpu.memory_space<vmem>>, vector<8x1xf32>,
    %c0_i32_27 = arith.constant 0 : i32
    %47 = arith.cmpi eq, %arg1, %c0_i32_27 : i32
    %48 = arith.extui %47 : i1 to i32
    %c0_i32_28 = arith.constant 0 : i32
    %49 = arith.cmpi ne, %48, %c0_i32_28 : i32
    scf.if %49 {
      %c0_29 = arith.constant 0 : index
      %c0_30 = arith.constant 0 : index
      %50 = vector.load %arg6[%c0_29, %c0_30] : memref<8x1xf32, #tpu.memory_space<vmem>>, vector<8x1xf32>
      %c0_31 = arith.constant 0 : index
      %c0_32 = arith.constant 0 : index
      %51 = vector.load %arg7[%c0_31, %c0_32] : memref<8x1xf32, #tpu.memory_space<vmem>>, vector<8x1xf32>
      %52 = math.log %51 : vector<8x1xf32>
      %53 = arith.addf %50, %52 : vector<8x1xf32>
      %c0_33 = arith.constant 0 : index
      %c0_34 = arith.constant 0 : index
      %54 = vector.load %arg8[%c0_33, %c0_34] : memref<8x1xf32, #tpu.memory_space<vmem>>, vector<8x1xf32>
      %55 = arith.subf %53, %54 : vector<8x1xf32>
      %c0_35 = arith.constant 0 : index
      %c0_36 = arith.constant 0 : index
      %56 = vector.load %arg5[%c0_35, %c0_36] : memref<8x1xf32, #tpu.memory_space<vmem>>, vector<8x1xf32>
      tpu.vector_store %arg5[%c0_35, %c0_36], %55 {strides = array<i32>} : memref<8x1xf32, #tpu.memory_space<vmem>>, vector<8x1xf32>,
    } else {
    }
    return
  }
  func.func @transform_0(%arg0: i32, %arg1: i32) -> (i32, i32) {
    %c0_i32 = arith.constant 0 : i32
    %c0_i32_0 = arith.constant 0 : i32
    return %arg0, %c0_i32 : i32, i32
  }
  func.func @transform_1(%arg0: i32, %arg1: i32) -> (i32, i32) {
    %c0_i32 = arith.constant 0 : i32
    %c0_i32_0 = arith.constant 0 : i32
    return %arg0, %c0_i32 : i32, i32
  }
  func.func @transform_2(%arg0: i32, %arg1: i32) -> (i32, i32) {
    %c0_i32 = arith.constant 0 : i32
    %c0_i32_0 = arith.constant 0 : i32
    return %arg1, %c0_i32 : i32, i32
  }
  func.func @transform_3(%arg0: i32, %arg1: i32) -> (i32, i32) {
    %c0_i32 = arith.constant 0 : i32
    %c0_i32_0 = arith.constant 0 : i32
    return %arg0, %c0_i32 : i32, i32
  }
}

</mosaic_0001>

<bundles_post_ra>
// kernel: tpu_custom_call.1
= control target key start
LH: loop header
LB: loop body
LE: loop exit
PB: predicated region body
PF: predicated region fallthrough
CT: control target
= control target key end

     0   :  { %8 = vsyncpa [#allocation7], 0  ;;  %s363_s0 = inlined_call_operand.hbm [shape: f32[8,32], index: 0, kind: input, shape index: {}]   ;;  %s364_s1 = inlined_call_operand.hbm [shape: f32[8,32], index: 1, kind: input, shape index: {}]   ;;  %s365_s2 = inlined_call_operand.hbm [shape: f32[8,32], index: 2, kind: input, shape index: {}]   ;;  %s366_s3 = inlined_call_operand.vmem [shape: f32[8,1], index: 3, kind: output, shape index: {}]  }
   0x1   :  { %9 = vsyncpa [#allocation9], 0  ;;  %s26_s14 = sshll.u32 %s364_s1, 4  ;;  %s309_s15 = smov [#allocation8]   ;;  %s27_s14 = int_to_ptr.hbm [resolvable:$true] %s26_s14 }
   0x2   :  { %s28_s16 = sshll.u32 %s309_s15, 4  ;;  %s15_s19 = sshll.u32 %s363_s0, 4  ;;  %s29_s16 = int_to_ptr.vmem [resolvable:$true] %s28_s16  ;;  %s16_s19 = int_to_ptr.hbm [resolvable:$true] %s15_s19 }
   0x3   :  { %31 = dma.hbm_to_vmem [thread:$0]  %s27_s14, 128, %s29_s16, [#allocation9]  }
   0x4   :  { %s310_s20 = smov [#allocation6]   ;;  %s37_s24 = sshll.u32 %s365_s2, 4  ;;  %s38_s24 = int_to_ptr.hbm [resolvable:$true] %s37_s24 }
   0x5   :  { %s17_s21 = sshll.u32 %s310_s20, 4  ;;  %s311_s1 = smov [#allocation10]   ;;  %s18_s21 = int_to_ptr.vmem [resolvable:$true] %s17_s21 }
   0x6   :  { %20 = dma.hbm_to_vmem [thread:$0]  %s16_s19, 128, %s18_s21, [#allocation7]  }
   0x7   :  { %s39_s25 = sshll.u32 %s311_s1, 4  ;;  %s40_s25 = int_to_ptr.vmem [resolvable:$true] %s39_s25 }
   0x8   :  { %42 = dma.hbm_to_vmem [thread:$0]  %s38_s24, 128, %s40_s25, [#allocation9]  }
   0x9   :  { %305 = dma.done.wait [#allocation7], 128  }
   0xa   :  { %306 = vsyncadd [#allocation7], 4294967168 }
   0xb   :  { %307 = dma.done.wait [#allocation9], 256  }
   0xc   :  { %308 = vsyncadd [#allocation9], 4294967040  ;;  %vm57_vm0 = vcmask 261120   ;;  %v74_v0 = vld [vmem:[#allocation10] sm:$0xff]  ;;  %v99_v1 = vld [vmem:[#allocation8] sm:$0xff]  ;;  %v312_v37 = vmov 0   ;;  %v154_v49 = vlaneseq }
   0xd   :  { %v75_v2 = vmul.f32 %v74_v0, %v74_v0  ;;  %v100_v3 = vmul.f32 %v99_v1, %v99_v1  ;;  %v55_v4 = vld [vmem:[#allocation6] sm:$0xff]  ;;  %219 = vset.pattern.permute.xlu2 %v312_v37  ;;  %220 = vset.pattern.permute.xlu0 %v312_v37  ;;  %vm96_vm10 = vcmask 7168   ;;  %vm148_vm11 = vcmask 64512  }
   0xe   :  { %v56_v7 = vmul.f32 %v55_v4, %v55_v4  ;;  %v313_v48 = vmov -inf   ;;  %v155_v50 = vshrl.u32 %v154_v49, 7  ;;  %v157_v51 = vand.u32 127, %v154_v49 }
   0xf   :  { %v76_v5 = vsel %vm57_vm0, %v75_v2, 0.0  ;;  %v101_v6 = vsel %vm57_vm0, %v100_v3, 0.0  ;;  %97 = vst.msk [vmem:[#allocation2] sm:$0xff] %vm96_vm10, %v313_v48  ;;  %v314_v57 = vmov 0.0  }
  0x10   :  { %77 = vadd.xlane.f32.xlu0 %v76_v5  ;;  %102 = vadd.xlane.f32.xlu1 %v101_v6  ;;  %v58_v8 = vsel %vm57_vm0, %v56_v7, 0.0  ;;  %vm158_vm12 = vcmp.eq.s32.totalorder %v155_v50, %v157_v51  ;;  %98 = vst.msk [vmem:[#allocation3] sm:$0xff] %vm96_vm10, %v314_v57 }
  0x16   :  { %v169_v58 = vld [vmem:[#allocation2] sm:$0xff] }
  0x17   :  { %v177_v5 = vld [vmem:[#allocation3] sm:$0xff] }
  0x18   :  { %59 = vadd.xlane.f32.xlu0 %v58_v8 }
  0x83   :  { %v78_v9 = vpop.xlane.xlu0 %77  ;;  %v103_v33 = vpop.xlane.xlu1 %102 }
  0x84   :  { %v79_v10 = vmax.f32 %v78_v9, 1e-24  ;;  %v104_v34 = vmax.f32 %v103_v33, 1e-24 }
  0x86   :  { %221 = vrsqrt.f32 %v79_v10  ;;  %vm86_vm2 = vweird.f32 %v79_v10  ;;  %vm111_vm7 = vweird.f32 %v104_v34 }
  0x8b   :  { %v60_v11 = vpop.xlane.xlu0 %59 }
  0x8c   :  { %v222_v12 = vpop.eup %221  ;;  %v61_v13 = vmax.f32 %v60_v11, 1e-24 }
  0x8d   :  { %v81_v14 = vmul.f32 %v222_v12, %v79_v10  ;;  %vm87_vm1 = vweird.f32 %v222_v12 }
  0x8e   :  { %223 = vrsqrt.f32 %v61_v13  ;;  %vm88_vm3 = vmor %vm86_vm2, %vm87_vm1  ;;  %vm68_vm5 = vweird.f32 %v61_v13 }
  0x8f   :  { %v82_v15 = vmul.f32 %v222_v12, %v81_v14  ;;  %225 = vrsqrt.f32 %v104_v34 }
  0x91   :  { %v83_v16 = vmul.f32 0.5, %v82_v15 }
  0x93   :  { %v84_v17 = vsub.f32 1.5, %v83_v16 }
  0x94   :  { %v224_v18 = vpop.eup %223 }
  0x95   :  { %v63_v19 = vmul.f32 %v224_v18, %v61_v13  ;;  %v85_v20 = vmul.f32 %v222_v12, %v84_v17  ;;  %vm69_vm4 = vweird.f32 %v224_v18  ;;  %v226_v35 = vpop.eup %225 }
  0x96   :  { %vm70_vm6 = vmor %vm68_vm5, %vm69_vm4  ;;  %v106_v36 = vmul.f32 %v226_v35, %v104_v34  ;;  %vm112_vm8 = vweird.f32 %v226_v35 }
  0x97   :  { %v64_v21 = vmul.f32 %v224_v18, %v63_v19  ;;  %v89_v22 = vsel %vm88_vm3, %v222_v12, %v85_v20  ;;  %vm113_vm9 = vmor %vm111_vm7, %vm112_vm8 }
  0x98   :  { %v90_v23 = vmul.f32 3.1622777, %v89_v22  ;;  %v107_v38 = vmul.f32 %v226_v35, %v106_v36 }
  0x99   :  { %v65_v24 = vmul.f32 0.5, %v64_v21 }
  0x9a   :  { %v91_v25 = vmul.f32 %v90_v23, %v74_v0  ;;  %v108_v39 = vmul.f32 0.5, %v107_v38 }
  0x9b   :  { %v66_v26 = vsub.f32 1.5, %v65_v24 }
  0x9c   :  { %211 = vmatpush.xpose.msk.msra.mxu0 %vm57_vm0, %v91_v25  ;;  %v109_v40 = vsub.f32 1.5, %v108_v39 }
  0x9d   :  { %v67_v27 = vmul.f32 %v224_v18, %v66_v26 }
  0x9e   :  { %v110_v41 = vmul.f32 %v226_v35, %v109_v40 }
  0x9f   :  { %v71_v28 = vsel %vm70_vm6, %v224_v18, %v67_v27 }
  0xa0   :  { %v72_v29 = vmul.f32 3.1622777, %v71_v28  ;;  %v114_v42 = vsel %vm113_vm9, %v226_v35, %v110_v41 }
  0xa1   :  { %v119_v43 = vmul.f32 3.1622777, %v114_v42 }
  0xa2   :  { %v73_v30 = vmul.f32 %v72_v29, %v55_v4 }
  0xa4   :  { %212 = vmatmul.msk.f32.vlgmr.msra.gmra.mxu0 %vm57_vm0, %v73_v30  ;;  %v115_v31 = vmul.f32 %v99_v1, %v73_v30 }
  0xa6   :  { %v116_v32 = vsel %vm57_vm0, %v115_v31, 0.0 }
  0xa7   :  { %117 = vadd.xlane.f32.xlu1 %v116_v32 }
 0x11a   :  { %v118_v44 = vpop.xlane.xlu1 %117 }
 0x11b   :  { %v120_v45 = vmul.f32 %v119_v43, %v118_v44 }
 0x11d   :  { %121 = vst.msk [vmem:[#allocation4] sm:$0xff] %vm96_vm10, %v120_v45 }
 0x121   :  { %v145_v46 = vpop.f32.mrf.mxu0 }
 0x122   :  { %149 = vst.msk [vmem:[#allocation5] sm:$0xff] %vm148_vm11, %v145_v46 }
 0x124   :  { %v202_v47 = vld [vmem:[#allocation4] sm:$0xff] }
 0x125   :  { %163 = vperm.xlu2 %219, %v202_v47  }
 0x129   :  { %v160_v52 = vld [vmem:[#allocation5] sm:$0xff] }
 0x17f   :  { %v164_v53 = vpop.permute.xlu2 %163 }
 0x180   :  { %v166_v54 = vsel %vm158_vm12, %v164_v53, %v160_v52 }
 0x181   :  { %167 = vst.msk [vmem:[#allocation5] sm:$0xff] %vm148_vm11, %v166_v54 }
 0x188   :  { %v168_v55 = vld [vmem:[#allocation5] sm:$0xff] }
 0x189   :  { %v170_v56 = vsel %vm148_vm11, %v168_v55, -inf }
 0x18a   :  { %171 = vmax.xlane.f32.xlu2 %v170_v56 }
 0x1fd   :  { %v172_v59 = vpop.xlane.xlu2 %171 }
 0x1fe   :  { %v173_v60 = vmax.f32 %v169_v58, %v172_v59 }
 0x200   :  { %v174_v61 = vsub.f32 %v169_v58, %v173_v60  ;;  %193 = vst.msk [vmem:[#allocation2] sm:$0xff] %vm96_vm10, %v173_v60  ;;  %181 = vperm.xlu0 %220, %v173_v60  }
 0x202   :  { %v175_v3 = vmul.f32 1.442695, %v174_v61 }
 0x207   :  { %v197_v12 = vld [vmem:[#allocation2] sm:$0xff] }
 0x272   :  { %v182_v62 = vpop.permute.xlu0 %181 }
 0x273   :  { %v184_v63 = vsub.f32 %v168_v55, %v182_v62 }
 0x275   :  { %v185_v0 = vmul.f32 1.442695, %v184_v63 }
 0x277   :  { %227 = vpow2.f32 %v185_v0 }
 0x278   :  { %229 = vpow2.f32 %v175_v3 }
 0x27d   :  { %v228_v1 = vpop.eup %227 }
 0x27e   :  { %v187_v2 = vsel %vm148_vm11, %v228_v1, 0.0  ;;  %v230_v4 = vpop.eup %229 }
 0x27f   :  { %188 = vadd.xlane.f32.xlu1 %v187_v2  ;;  %v178_v6 = vmul.f32 %v230_v4, %v177_v5 }
 0x2f2   :  { %v189_v7 = vpop.xlane.xlu1 %188 }
 0x2f3   :  { %v190_v8 = vadd.f32 %v189_v7, %v178_v6 }
 0x2f5   :  { %192 = vst.msk [vmem:[#allocation3] sm:$0xff] %vm96_vm10, %v190_v8 }
 0x2fc   :  { %v198_v9 = vld [vmem:[#allocation3] sm:$0xff] }
 0x2fd   :  { %231 = vlog2.f32 %v198_v9 }
 0x303   :  { %v232_v10 = vpop.eup %231 }
 0x304   :  { %v200_v11 = vmul.f32 0.6931472, %v232_v10 }
 0x306   :  { %v201_v13 = vadd.f32 %v200_v11, %v197_v12 }
 0x308   :  { %v203_v14 = vsub.f32 %v201_v13, %v202_v47 }
 0x30a   :  { %204 = vst.msk [vmem:[%s366_s3] sm:$0xff] %vm96_vm10, %v203_v14 }
 0x30b   :  { %209 = vsyncpa [#allocation7], 1 }
 0x30c   :  { %210 = vsyncpa [#allocation9], 1 }

</bundles_post_ra>
